<compile_context>
chip_gen: v5e
topology: v5e:2x2
jax: 0.10.0
libtpu: 0.0.40
codegen_flags: <defaults>
</compile_context>

<pallas_src>
import functools

import jax
import jax.numpy as jnp
from jax.experimental import pallas as pl
from jax.experimental.pallas import tpu as pltpu

# ----------------------------- config (synthetic args) -----------------------
TAU = 1
NUM_FEATURES = 32 * TAU          # self.num_features = 32 * args.tau
NUM_CLASSES = 12                 # args.num_classes (gsc2-style)
TEMPERATURE = 16.0               # args.temperature
C_MID = 16                       # stem channels of the simplified encoder
KSIZE = 3                        # 3x3 stem conv
C_PAD = ((NUM_CLASSES + 127) // 128) * 128   # lane-pad the class dim


def _round_up(n, m):
    return ((n + m - 1) // m) * m


# ----------------------------- Pallas kernel ---------------------------------
def mynet_kernel(x_ref, mask_ref, w1c_ref, w2_ref, fcnt_ref, o_ref, xf_ref, *,
                 c_in, tap_shifts, p_out):
    """Fused MYNET 'cos' forward for one batch element (grid = (B,)).

    x_ref    : (1, C, P2) bf16   zero-padded input, flattened row-major over
                                 the (H+2, W+2) padded grid, lane-padded.
    mask_ref : (1, P_OUT) f32    1.0 at flattened positions that are real conv
                                 outputs, 0.0 at padded-grid / lane padding.
    w1c_ref  : (C*9, C_MID, 1)   stem conv weight, one (C_MID,1) column per tap.
    w2_ref   : (C_MID, D)        projection to encoder features.
    fcnt_ref : (D, C_PAD)        temperature * L2-normalized fc.weight^T.
    o_ref    : (1, 8, C_PAD)     logits (row 0 valid, lane-dense).
    xf_ref   : (C, P2) f32       VMEM scratch: f32 copy of this batch's input.
    """
    # Single bf16 -> f32 upcast; all vector math below is f32 on every gen.
    xf_ref[...] = x_ref[0].astype(jnp.float32)

    # 3x3 'same' conv via 9 statically shifted taps of the flattened padded
    # grid:  h[m, i*(W+2)+j] = sum_{c,di,dj} w[m,c,di,dj] * xpad[c, i+di, j+dj]
    # (im2col fused: the 9x patch tensor never touches HBM).
    n_taps = len(tap_shifts)
    h = jnp.zeros((C_MID, p_out), jnp.float32)
    for c in range(c_in):
        for t, s in enumerate(tap_shifts):
            wk = w1c_ref[c * n_taps + t]               # (C_MID, 1)
            xs = xf_ref[c:c + 1, s:s + p_out]          # (1, P_OUT) shifted tap
            h = h + wk * xs                            # VPU broadcast FMA
    h = jnp.maximum(h, 0.0)                            # ReLU

    # Masked global average pool.  The mask excludes padded-grid columns and
    # lane padding; the 1/HW scale is dropped (it cancels under the L2 norm).
    pooled = jnp.sum(h * mask_ref[...], axis=-1, keepdims=True)       # (C_MID, 1)

    # Feature projection without an in-kernel transpose:
    #   feat[0, d] = sum_c pooled[c, 0] * w2[c, d]
    feat = jnp.sum(pooled * w2_ref[...], axis=0, keepdims=True)       # (1, D)
    # F.normalize(feat, p=2, dim=-1) == feat / max(||feat||, 1e-12)
    ssq = jnp.sum(feat * feat, axis=-1, keepdims=True)
    feat_n = feat * jax.lax.rsqrt(jnp.maximum(ssq, 1e-24))
    # Cosine logits * temperature (fc.weight pre-normalized/scaled/padded).
    logits = jnp.dot(feat_n, fcnt_ref[...],
                     preferred_element_type=jnp.float32)              # (1, C_PAD)
    o_ref[0] = jnp.broadcast_to(logits, (8, C_PAD))


# ----------------------------- glue (plain JAX) -------------------------------
@jax.jit
def mynet_forward(x, w1, w2, fc_w):
    """x: (B,C,H,W) f32; w1: (C_MID,C,3,3); w2: (C_MID,D); fc_w: (NC,D)."""
    B, C, H, W = x.shape
    wp = W + 2                                    # padded-grid row stride
    p_grid = (H + 2) * wp                         # flattened padded-grid size
    tap_shifts = tuple(di * wp + dj
                       for di in range(KSIZE) for dj in range(KSIZE))
    p_out = _round_up(H * wp, 128)                # lane-dense conv-output width
    p2 = _round_up(p_out + tap_shifts[-1], 128)   # input width + slice headroom

    # Zero-pad spatially (+1 border), flatten row-major, lane-pad, cast bf16
    # (halves the dominant HBM read; kernel math stays f32).
    xp = jnp.pad(x, ((0, 0), (0, 0), (1, 1), (1, 1)))
    x_flat = xp.reshape(B, C, p_grid)
    x_flat = jnp.pad(x_flat, ((0, 0), (0, 0), (0, p2 - p_grid)))
    x_flat = x_flat.astype(jnp.bfloat16)

    # Validity mask over flattened conv-output positions p = i*(W+2)+j.
    p_idx = jnp.arange(p_out, dtype=jnp.int32)
    mask = (((p_idx // wp) < H) & ((p_idx % wp) < W)
            ).astype(jnp.float32)[None, :]                      # (1, P_OUT)

    # Stem weight as one (C_MID, 1) column per (channel, tap).
    k = C * KSIZE * KSIZE
    w1cols = w1.reshape(C_MID, k).T.reshape(k, C_MID, 1)

    # Constant fc.weight work hoisted out of the kernel:
    # temperature * L2-normalize(rows), transposed, lane-padded to 128.
    fc_n = fc_w / jnp.maximum(
        jnp.linalg.norm(fc_w, axis=-1, keepdims=True), 1e-12)
    fcnt = jnp.pad((TEMPERATURE * fc_n).T,
                   ((0, 0), (0, C_PAD - NUM_CLASSES)))          # (D, C_PAD)

    kernel = functools.partial(mynet_kernel, c_in=C,
                               tap_shifts=tap_shifts, p_out=p_out)
    out = pl.pallas_call(
        kernel,
        out_shape=jax.ShapeDtypeStruct((B, 8, C_PAD), jnp.float32),
        grid_spec=pltpu.PrefetchScalarGridSpec(
            num_scalar_prefetch=0,
            grid=(B,),                                # batch only; HW axis gone
            in_specs=[
                pl.BlockSpec((1, C, p2), lambda b: (b, 0, 0)),
                pl.BlockSpec((1, p_out), lambda b: (0, 0)),
                pl.BlockSpec((k, C_MID, 1), lambda b: (0, 0, 0)),
                pl.BlockSpec((C_MID, NUM_FEATURES), lambda b: (0, 0)),
                pl.BlockSpec((NUM_FEATURES, C_PAD), lambda b: (0, 0)),
            ],
            out_specs=pl.BlockSpec((1, 8, C_PAD), lambda b: (b, 0, 0)),
            scratch_shapes=[pltpu.VMEM((C, p2), jnp.float32)],
        ),
        compiler_params=pltpu.CompilerParams(
            dimension_semantics=("parallel",)),       # v7x: one batch per core
    )(x_flat, mask, w1cols, w2, fcnt)

    return out[:, 0, :NUM_CLASSES]


def _reference_forward(x, w1, w2, fc_w):
    """Pure-JAX reference (same math, full precision) for a sanity check."""
    h = jax.lax.conv_general_dilated(
        x, w1, window_strides=(1, 1), padding="SAME",
        dimension_numbers=("NCHW", "OIHW", "NCHW"),
        precision=jax.lax.Precision.HIGHEST)
    h = jnp.maximum(h, 0.0)
    pooled = jnp.mean(h, axis=(2, 3))                           # (B, C_MID)
    feat = jnp.dot(pooled, w2, precision=jax.lax.Precision.HIGHEST)
    feat_n = feat / jnp.maximum(
        jnp.linalg.norm(feat, axis=-1, keepdims=True), 1e-12)
    w_n = fc_w / jnp.maximum(
        jnp.linalg.norm(fc_w, axis=-1, keepdims=True), 1e-12)
    return TEMPERATURE * jnp.dot(feat_n, w_n.T,
                                 precision=jax.lax.Precision.HIGHEST)


# ----------------------------- main -------------------------------------------
if __name__ == "__main__":
    key = jax.random.PRNGKey(0)
    k_x, k_w1, k_w2, k_fc = jax.random.split(key, 4)

    B, C_IN, H, W = 2, 1, 16, 16                    # gsc2-style 1-channel input
    x = jax.random.normal(k_x, (B, C_IN, H, W), dtype=jnp.float32)

    # deterministic parameter init (kaiming-uniform-ish fan-in scaling)
    k_fan = C_IN * KSIZE * KSIZE
    w1 = jax.random.uniform(k_w1, (C_MID, C_IN, KSIZE, KSIZE), jnp.float32,
                            -1.0 / jnp.sqrt(k_fan), 1.0 / jnp.sqrt(k_fan))
    w2 = jax.random.uniform(k_w2, (C_MID, NUM_FEATURES), jnp.float32,
                            -1.0 / jnp.sqrt(C_MID), 1.0 / jnp.sqrt(C_MID))
    fc_w = jax.random.uniform(k_fc, (NUM_CLASSES, NUM_FEATURES), jnp.float32,
                              -1.0 / jnp.sqrt(NUM_FEATURES),
                              1.0 / jnp.sqrt(NUM_FEATURES))

    out = jax.block_until_ready(mynet_forward(x, w1, w2, fc_w))

    # The kernel consumes x rounded to bf16 (deliberate bandwidth optimization
    # from the perf review); validate the kernel's math against a full-precision
    # reference fed the same rounded input, so only real bugs can trip this.
    x_q = x.astype(jnp.bfloat16).astype(jnp.float32)
    ref = _reference_forward(x_q, w1, w2, fc_w)

    assert out.shape == (B, NUM_CLASSES)
    assert jnp.allclose(out, ref, rtol=1e-2, atol=1e-2), "mismatch vs reference"

    print("KERNEL_OK")
</pallas_src>

<mosaic_0001>
module attributes {stable_mosaic.version = 11 : i64} {
  func.func @mynet_kernel(%arg0: i32, %arg1: memref<1x1x512xbf16, #tpu.memory_space<vmem>>, %arg2: memref<1x384xf32, #tpu.memory_space<vmem>>, %arg3: memref<9x16x1xf32, #tpu.memory_space<vmem>>, %arg4: memref<16x32xf32, #tpu.memory_space<vmem>>, %arg5: memref<32x128xf32, #tpu.memory_space<vmem>>, %arg6: memref<1x8x128xf32, #tpu.memory_space<vmem>>, %arg7: memref<1x512xf32, #tpu.memory_space<vmem>>) attributes {dimension_semantics = [#tpu.dimension_semantics<parallel>], iteration_bounds = array<i64: 2>, scalar_prefetch = 0 : i64, scratch_operands = 1 : i64, tpu.core_type = #tpu.core_type<tc>, window_params = [{transform_indices = @transform_0, window_bounds = array<i64: 1, 1, 512>}, {pipeline_mode = #tpu.pipeline_mode<synchronous>, transform_indices = @transform_1, window_bounds = array<i64: 1, 384>}, {pipeline_mode = #tpu.pipeline_mode<synchronous>, transform_indices = @transform_2, window_bounds = array<i64: 9, 16, 1>}, {pipeline_mode = #tpu.pipeline_mode<synchronous>, transform_indices = @transform_3, window_bounds = array<i64: 16, 32>}, {pipeline_mode = #tpu.pipeline_mode<synchronous>, transform_indices = @transform_4, window_bounds = array<i64: 32, 128>}, {transform_indices = @transform_5, window_bounds = array<i64: 1, 8, 128>}]} {
    %c0 = arith.constant 0 : index
    %c0_0 = arith.constant 0 : index
    %c0_1 = arith.constant 0 : index
    %0 = vector.load %arg1[%c0, %c0_0, %c0_1] : memref<1x1x512xbf16, #tpu.memory_space<vmem>>, vector<1x1x512xbf16>
    %1 = vector.shape_cast %0 : vector<1x1x512xbf16> to vector<1x512xbf16>
    %2 = arith.extf %1 : vector<1x512xbf16> to vector<1x512xf32>
    %c0_2 = arith.constant 0 : index
    %c0_3 = arith.constant 0 : index
    %3 = vector.load %arg7[%c0_2, %c0_3] : memref<1x512xf32, #tpu.memory_space<vmem>>, vector<1x512xf32>
    tpu.vector_store %arg7[%c0_2, %c0_3], %2 {strides = array<i32>} : memref<1x512xf32, #tpu.memory_space<vmem>>, vector<1x512xf32>,
    %cst = arith.constant 0.000000e+00 : f32
    %4 = vector.broadcast %cst : f32 to vector<16x384xf32>
    %c0_4 = arith.constant 0 : index
    %c0_5 = arith.constant 0 : index
    %c0_6 = arith.constant 0 : index
    %5 = vector.load %arg3[%c0_4, %c0_5, %c0_6] : memref<9x16x1xf32, #tpu.memory_space<vmem>>, vector<1x16x1xf32>
    %6 = vector.shape_cast %5 : vector<1x16x1xf32> to vector<16x1xf32>
    %c0_7 = arith.constant 0 : index
    %c0_8 = arith.constant 0 : index
    %7 = vector.load %arg7[%c0_7, %c0_8] : memref<1x512xf32, #tpu.memory_space<vmem>>, vector<1x384xf32>
    %8 = vector.broadcast %6 : vector<16x1xf32> to vector<16x384xf32>
    %9 = vector.broadcast %7 : vector<1x384xf32> to vector<16x384xf32>
    %10 = arith.mulf %8, %9 : vector<16x384xf32>
    %11 = arith.addf %4, %10 : vector<16x384xf32>
    %c1 = arith.constant 1 : index
    %c0_9 = arith.constant 0 : index
    %c0_10 = arith.constant 0 : index
    %12 = vector.load %arg3[%c1, %c0_9, %c0_10] : memref<9x16x1xf32, #tpu.memory_space<vmem>>, vector<1x16x1xf32>
    %13 = vector.shape_cast %12 : vector<1x16x1xf32> to vector<16x1xf32>
    %c0_11 = arith.constant 0 : index
    %c1_12 = arith.constant 1 : index
    %14 = vector.load %arg7[%c0_11, %c1_12] : memref<1x512xf32, #tpu.memory_space<vmem>>, vector<1x384xf32>
    %15 = vector.broadcast %13 : vector<16x1xf32> to vector<16x384xf32>
    %16 = vector.broadcast %14 : vector<1x384xf32> to vector<16x384xf32>
    %17 = arith.mulf %15, %16 : vector<16x384xf32>
    %18 = arith.addf %11, %17 : vector<16x384xf32>
    %c2 = arith.constant 2 : index
    %c0_13 = arith.constant 0 : index
    %c0_14 = arith.constant 0 : index
    %19 = vector.load %arg3[%c2, %c0_13, %c0_14] : memref<9x16x1xf32, #tpu.memory_space<vmem>>, vector<1x16x1xf32>
    %20 = vector.shape_cast %19 : vector<1x16x1xf32> to vector<16x1xf32>
    %c0_15 = arith.constant 0 : index
    %c2_16 = arith.constant 2 : index
    %21 = vector.load %arg7[%c0_15, %c2_16] : memref<1x512xf32, #tpu.memory_space<vmem>>, vector<1x384xf32>
    %22 = vector.broadcast %20 : vector<16x1xf32> to vector<16x384xf32>
    %23 = vector.broadcast %21 : vector<1x384xf32> to vector<16x384xf32>
    %24 = arith.mulf %22, %23 : vector<16x384xf32>
    %25 = arith.addf %18, %24 : vector<16x384xf32>
    %c3 = arith.constant 3 : index
    %c0_17 = arith.constant 0 : index
    %c0_18 = arith.constant 0 : index
    %26 = vector.load %arg3[%c3, %c0_17, %c0_18] : memref<9x16x1xf32, #tpu.memory_space<vmem>>, vector<1x16x1xf32>
    %27 = vector.shape_cast %26 : vector<1x16x1xf32> to vector<16x1xf32>
    %c0_19 = arith.constant 0 : index
    %c18 = arith.constant 18 : index
    %28 = vector.load %arg7[%c0_19, %c18] : memref<1x512xf32, #tpu.memory_space<vmem>>, vector<1x384xf32>
    %29 = vector.broadcast %27 : vector<16x1xf32> to vector<16x384xf32>
    %30 = vector.broadcast %28 : vector<1x384xf32> to vector<16x384xf32>
    %31 = arith.mulf %29, %30 : vector<16x384xf32>
    %32 = arith.addf %25, %31 : vector<16x384xf32>
    %c4 = arith.constant 4 : index
    %c0_20 = arith.constant 0 : index
    %c0_21 = arith.constant 0 : index
    %33 = vector.load %arg3[%c4, %c0_20, %c0_21] : memref<9x16x1xf32, #tpu.memory_space<vmem>>, vector<1x16x1xf32>
    %34 = vector.shape_cast %33 : vector<1x16x1xf32> to vector<16x1xf32>
    %c0_22 = arith.constant 0 : index
    %c19 = arith.constant 19 : index
    %35 = vector.load %arg7[%c0_22, %c19] : memref<1x512xf32, #tpu.memory_space<vmem>>, vector<1x384xf32>
    %36 = vector.broadcast %34 : vector<16x1xf32> to vector<16x384xf32>
    %37 = vector.broadcast %35 : vector<1x384xf32> to vector<16x384xf32>
    %38 = arith.mulf %36, %37 : vector<16x384xf32>
    %39 = arith.addf %32, %38 : vector<16x384xf32>
    %c5 = arith.constant 5 : index
    %c0_23 = arith.constant 0 : index
    %c0_24 = arith.constant 0 : index
    %40 = vector.load %arg3[%c5, %c0_23, %c0_24] : memref<9x16x1xf32, #tpu.memory_space<vmem>>, vector<1x16x1xf32>
    %41 = vector.shape_cast %40 : vector<1x16x1xf32> to vector<16x1xf32>
    %c0_25 = arith.constant 0 : index
    %c20 = arith.constant 20 : index
    %42 = vector.load %arg7[%c0_25, %c20] : memref<1x512xf32, #tpu.memory_space<vmem>>, vector<1x384xf32>
    %43 = vector.broadcast %41 : vector<16x1xf32> to vector<16x384xf32>
    %44 = vector.broadcast %42 : vector<1x384xf32> to vector<16x384xf32>
    %45 = arith.mulf %43, %44 : vector<16x384xf32>
    %46 = arith.addf %39, %45 : vector<16x384xf32>
    %c6 = arith.constant 6 : index
    %c0_26 = arith.constant 0 : index
    %c0_27 = arith.constant 0 : index
    %47 = vector.load %arg3[%c6, %c0_26, %c0_27] : memref<9x16x1xf32, #tpu.memory_space<vmem>>, vector<1x16x1xf32>
    %48 = vector.shape_cast %47 : vector<1x16x1xf32> to vector<16x1xf32>
    %c0_28 = arith.constant 0 : index
    %c36 = arith.constant 36 : index
    %49 = vector.load %arg7[%c0_28, %c36] : memref<1x512xf32, #tpu.memory_space<vmem>>, vector<1x384xf32>
    %50 = vector.broadcast %48 : vector<16x1xf32> to vector<16x384xf32>
    %51 = vector.broadcast %49 : vector<1x384xf32> to vector<16x384xf32>
    %52 = arith.mulf %50, %51 : vector<16x384xf32>
    %53 = arith.addf %46, %52 : vector<16x384xf32>
    %c7 = arith.constant 7 : index
    %c0_29 = arith.constant 0 : index
    %c0_30 = arith.constant 0 : index
    %54 = vector.load %arg3[%c7, %c0_29, %c0_30] : memref<9x16x1xf32, #tpu.memory_space<vmem>>, vector<1x16x1xf32>
    %55 = vector.shape_cast %54 : vector<1x16x1xf32> to vector<16x1xf32>
    %c0_31 = arith.constant 0 : index
    %c37 = arith.constant 37 : index
    %56 = vector.load %arg7[%c0_31, %c37] : memref<1x512xf32, #tpu.memory_space<vmem>>, vector<1x384xf32>
    %57 = vector.broadcast %55 : vector<16x1xf32> to vector<16x384xf32>
    %58 = vector.broadcast %56 : vector<1x384xf32> to vector<16x384xf32>
    %59 = arith.mulf %57, %58 : vector<16x384xf32>
    %60 = arith.addf %53, %59 : vector<16x384xf32>
    %c8 = arith.constant 8 : index
    %c0_32 = arith.constant 0 : index
    %c0_33 = arith.constant 0 : index
    %61 = vector.load %arg3[%c8, %c0_32, %c0_33] : memref<9x16x1xf32, #tpu.memory_space<vmem>>, vector<1x16x1xf32>
    %62 = vector.shape_cast %61 : vector<1x16x1xf32> to vector<16x1xf32>
    %c0_34 = arith.constant 0 : index
    %c38 = arith.constant 38 : index
    %63 = vector.load %arg7[%c0_34, %c38] : memref<1x512xf32, #tpu.memory_space<vmem>>, vector<1x384xf32>
    %64 = vector.broadcast %62 : vector<16x1xf32> to vector<16x384xf32>
    %65 = vector.broadcast %63 : vector<1x384xf32> to vector<16x384xf32>
    %66 = arith.mulf %64, %65 : vector<16x384xf32>
    %67 = arith.addf %60, %66 : vector<16x384xf32>
    %cst_35 = arith.constant 0.000000e+00 : f32
    %68 = vector.broadcast %cst_35 : f32 to vector<16x384xf32>
    %69 = arith.maximumf %67, %68 : vector<16x384xf32>
    %c0_36 = arith.constant 0 : index
    %c0_37 = arith.constant 0 : index
    %70 = vector.load %arg2[%c0_36, %c0_37] : memref<1x384xf32, #tpu.memory_space<vmem>>, vector<1x384xf32>
    %71 = vector.broadcast %70 : vector<1x384xf32> to vector<16x384xf32>
    %72 = arith.mulf %69, %71 : vector<16x384xf32>
    %cst_38 = arith.constant dense<0.000000e+00> : vector<16xf32>
    %73 = vector.multi_reduction <add>, %72, %cst_38 [1] : vector<16x384xf32> to vector<16xf32>
    %74 = vector.shape_cast %73 : vector<16xf32> to vector<16x1xf32>
    %c0_39 = arith.constant 0 : index
    %c0_40 = arith.constant 0 : index
    %75 = vector.load %arg4[%c0_39, %c0_40] : memref<16x32xf32, #tpu.memory_space<vmem>>, vector<16x32xf32>
    %76 = vector.broadcast %74 : vector<16x1xf32> to vector<16x32xf32>
    %77 = arith.mulf %76, %75 : vector<16x32xf32>
    %cst_41 = arith.constant dense<0.000000e+00> : vector<32xf32>
    %78 = vector.multi_reduction <add>, %77, %cst_41 [0] : vector<16x32xf32> to vector<32xf32>
    %79 = vector.shape_cast %78 : vector<32xf32> to vector<1x32xf32>
    %80 = arith.mulf %79, %79 : vector<1x32xf32>
    %cst_42 = arith.constant dense<0.000000e+00> : vector<1xf32>
    %81 = vector.multi_reduction <add>, %80, %cst_42 [1] : vector<1x32xf32> to vector<1xf32>
    %82 = vector.shape_cast %81 : vector<1xf32> to vector<1x1xf32>
    %cst_43 = arith.constant 1.000000e-24 : f32
    %83 = vector.broadcast %cst_43 : f32 to vector<1x1xf32>
    %84 = arith.maximumf %82, %83 : vector<1x1xf32>
    %85 = math.rsqrt %84 : vector<1x1xf32>
    %86 = vector.broadcast %85 : vector<1x1xf32> to vector<1x32xf32>
    %87 = arith.mulf %79, %86 : vector<1x32xf32>
    %c0_44 = arith.constant 0 : index
    %c0_45 = arith.constant 0 : index
    %88 = vector.load %arg5[%c0_44, %c0_45] : memref<32x128xf32, #tpu.memory_space<vmem>>, vector<32x128xf32>
    %cst_46 = arith.constant dense<0.000000e+00> : vector<1x128xf32>
    %89 = tpu.matmul %87, %88, %cst_46 {dimension_numbers = #tpu.dot_dimension_numbers<[1], [0], [0], [1], [0, 0, 1, 1], [], []>} : vector<1x32xf32>, vector<32x128xf32>, vector<1x128xf32> -> vector<1x128xf32>
    %90 = vector.shape_cast %89 : vector<1x128xf32> to vector<1x128xf32>
    %91 = vector.broadcast %90 : vector<1x128xf32> to vector<8x128xf32>
    %c0_47 = arith.constant 0 : index
    %c0_48 = arith.constant 0 : index
    %c0_49 = arith.constant 0 : index
    %92 = vector.load %arg6[%c0_47, %c0_48, %c0_49] : memref<1x8x128xf32, #tpu.memory_space<vmem>>, vector<1x8x128xf32>
    %93 = vector.shape_cast %92 : vector<1x8x128xf32> to vector<8x128xf32>
    %94 = vector.shape_cast %91 : vector<8x128xf32> to vector<1x8x128xf32>
    tpu.vector_store %arg6[%c0_47, %c0_48, %c0_49], %94 {strides = array<i32>} : memref<1x8x128xf32, #tpu.memory_space<vmem>>, vector<1x8x128xf32>,
    return
  }
  func.func @transform_0(%arg0: i32) -> (i32, i32, i32) {
    %c0_i32 = arith.constant 0 : i32
    %c0_i32_0 = arith.constant 0 : i32
    %c0_i32_1 = arith.constant 0 : i32
    return %arg0, %c0_i32, %c0_i32_0 : i32, i32, i32
  }
  func.func @transform_1(%arg0: i32) -> (i32, i32) {
    %c0_i32 = arith.constant 0 : i32
    %c0_i32_0 = arith.constant 0 : i32
    %c0_i32_1 = arith.constant 0 : i32
    return %c0_i32, %c0_i32_0 : i32, i32
  }
  func.func @transform_2(%arg0: i32) -> (i32, i32, i32) {
    %c0_i32 = arith.constant 0 : i32
    %c0_i32_0 = arith.constant 0 : i32
    %c0_i32_1 = arith.constant 0 : i32
    %c0_i32_2 = arith.constant 0 : i32
    return %c0_i32, %c0_i32_0, %c0_i32_1 : i32, i32, i32
  }
  func.func @transform_3(%arg0: i32) -> (i32, i32) {
    %c0_i32 = arith.constant 0 : i32
    %c0_i32_0 = arith.constant 0 : i32
    %c0_i32_1 = arith.constant 0 : i32
    return %c0_i32, %c0_i32_0 : i32, i32
  }
  func.func @transform_4(%arg0: i32) -> (i32, i32) {
    %c0_i32 = arith.constant 0 : i32
    %c0_i32_0 = arith.constant 0 : i32
    %c0_i32_1 = arith.constant 0 : i32
    return %c0_i32, %c0_i32_0 : i32, i32
  }
  func.func @transform_5(%arg0: i32) -> (i32, i32, i32) {
    %c0_i32 = arith.constant 0 : i32
    %c0_i32_0 = arith.constant 0 : i32
    %c0_i32_1 = arith.constant 0 : i32
    return %arg0, %c0_i32, %c0_i32_0 : i32, i32, i32
  }
}

</mosaic_0001>

<bundles_post_ra>
// kernel: mynet_forward.1
= control target key start
LH: loop header
LB: loop body
LE: loop exit
PB: predicated region body
PF: predicated region fallthrough
CT: control target
= control target key end

     0   :  { %s1027_s18 = smov 0   ;;  %s1336_s0 = inlined_call_operand.vmem [shape: bf16[2,1,512], index: 0, kind: input, shape index: {}]   ;;  %s1337_s1 = inlined_call_operand.vmem [shape: f32[1,384], index: 1, kind: input, shape index: {}]   ;;  %s1338_s2 = inlined_call_operand.vmem [shape: f32[9,16,1], index: 2, kind: input, shape index: {}]   ;;  %s1339_s3 = inlined_call_operand.vmem [shape: f32[16,32], index: 3, kind: input, shape index: {}]   ;;  %s1340_s4 = inlined_call_operand.vmem [shape: f32[32,128], index: 4, kind: input, shape index: {}]   ;;  %s1341_s5 = inlined_call_operand.vmem [shape: f32[2,8,128], index: 5, kind: output, shape index: {}]  }
   0x1 LB: > { %s932_s19 = sadd.s32 4294967295, %s986_s18   ;;  %p936_p0 = scmp.ge.s32.totalorder %s986_s18, 1  ;;  %s986_s18 = sphi %s1027_s18, %s15_s18  }
   0x2   : > { %p186_p1 = scmp.lt.s32.totalorder %s986_s18, 3 }
   0x4   : > { %p187_p2 = pnand %p936_p0, %p186_p1 }
   0x5   : > { %p212_p3 = scmp.lt.s32.totalorder (!%p187_p2), %s932_s19, 1  ;;  %s989_s12 = smov (!%p187_p2), 127  }
   0x6   : > { %190 = sbr.rel (%p187_p2) target bundleno = 826 (0x33a), region = 40  ;;  %s990_s13 = smov (!%p187_p2), 126  }
   0x7   : > { %s991_s14 = smov (!%p187_p2), 110   ;;  %s992_s15 = smov (!%p187_p2), 109  }
   0x8   : > { %s993_s16 = smov (!%p187_p2), 108   ;;  %s994_s17 = smov (!%p187_p2), 92  }
   0x9   : > { %s995_s20 = smov (!%p187_p2), 91   ;;  %s996_s21 = smov (!%p187_p2), 90  }
   0xb   : > { %v941_v0 = vld [vmem:[%s1338_s2 + $0x20] sm:$0xff]  ;;  %v939_v1 = vld [vmem:[%s1338_s2 + $0x10] sm:$0xff]  ;;  %v988_v2 = vmov 0   ;;  %v942_v4 = vld [vmem:[%s1338_s2 + $0x28] sm:$0xff]  ;;  %s1343_s19 = smov (!%p212_p3, %s932_s19), 1  ;;  %vm226_vm0 = vcmask 1040384   ;;  %v233_v24 = vlaneseq }
   0xc   : > { %976 = vset.pattern.permute.xlu1 %v988_v2  ;;  %975 = vset.pattern.permute.xlu0 %v988_v2  ;;  %v943_v3 = vld [vmem:[%s1338_s2 + $0x30] sm:$0xff]  ;;  %v940_v5 = vld [vmem:[%s1338_s2 + $0x18] sm:$0xff]  ;;  %v946_v7 = vld [vmem:[%s1338_s2 + $0x48] sm:$0xff]  ;;  %s937_s8 = sshll.u32 %s1343_s19, 2  ;;  %vm228_vm1 = vcmask 1042434   ;;  %vm230_vm2 = vcmask 1041408  }
   0xd   : > { %349 = vperm.xlu1 %976, %v941_v0   ;;  %276 = vperm.xlu0 %975, %v939_v1   ;;  %v944_v6 = vld [vmem:[%s1338_s2 + $0x38] sm:$0xff]  ;;  %v945_v8 = vld [vmem:[%s1338_s2 + $0x40] sm:$0xff]  ;;  %v947_v9 = vld [vmem:[%s1338_s2 + $0x50] sm:$0xff]  ;;  %s215_s11 = scalar_lea.vmem %s1336_s0, %s937_s8  ;;  %vm235_vm3 = vcmp.lt.s32.totalorder %v233_v24, 512  ;;  %vm325_vm4 = vcmask 1039360   ;;  %vm389_vm5 = vcmask 1031168  }
   0xe   : > { %977 = vset.pattern.permute.xlu2 %v988_v2  ;;  %v949_v10 = vld [vmem:[%s1338_s2 + $0x60] sm:$0xff]  ;;  %v948_v11 = vld [vmem:[%s1338_s2 + $0x58] sm:$0xff]  ;;  %v950_v12 = vld [vmem:[%s1338_s2 + $0x68] sm:$0xff]  ;;  %vm453_vm6 = vcmask 900096   ;;  %vm517_vm7 = vcmask 891904   ;;  %vm581_vm8 = vcmask 883712  }
   0xf   : > { %413 = vperm.xlu2 %977, %v943_v3   ;;  %v952_v13 = vld [vmem:[%s1338_s2 + $0x78] sm:$0xff]  ;;  %v951_v14 = vld [vmem:[%s1338_s2 + $0x70] sm:$0xff]  ;;  %v953_v15 = vld [vmem:[%s1338_s2 + $0x80] sm:$0xff]  ;;  %vm645_vm9 = vcmask 752640   ;;  %vm709_vm10 = vcmask 744448   ;;  %vm773_vm11 = vcmask 736256  }
  0x10   : > { %v954_v16 = vld [vmem:[%s1338_s2 + $0x88] sm:$0xff]  ;;  %v238_v17 = vld [vmem:[%s1338_s2] sm:$0xff]  ;;  %vm824_vm12 = vcmask 261120  }
  0x11   : > { %v239_v18 = vld [vmem:[%s1338_s2 + $0x8] sm:$0xff]  ;;  %v220_v19 = vld [vmem:[%s215_s11] sm:$0xf]  ;;  %s938_s11 = sshll.u32 %s1343_s19, 3 }
  0x12   : > { %v221_v20 = vunpack.c.l.bf16 %v220_v19 }
  0x14   : > { %v223_v21 = vrot.slane %v221_v20, 1  ;;  %v224_v22 = vrot.slane %v221_v20, 2  ;;  %v225_v23 = vrot.slane %v221_v20, 3 }
  0x15   : > { %354 = vperm.xlu1 %976, %v942_v4   ;;  %281 = vperm.xlu0 %975, %v940_v5  }
  0x16   : > { %v227_v25 = vsel %vm226_vm0, %v221_v20, %v223_v21  ;;  %v229_v26 = vsel %vm228_vm1, %v224_v22, %v225_v23 }
  0x17   : > { %418 = vperm.xlu2 %977, %v944_v6   ;;  %v231_v27 = vsel %vm230_vm2, %v227_v25, %v229_v26 }
  0x18   : > { %237 = vst.msk [vmem:[#allocation2] sm:$0xf] %vm235_vm3, %v231_v27 }
  0x1d   : > { %482 = vperm.xlu1 %976, %v946_v7   ;;  %477 = vperm.xlu0 %975, %v945_v8  }
  0x1f   : > { %541 = vperm.xlu2 %977, %v947_v9   ;;  %v273_v30 = vld [vmem:[#allocation2] sm:$0xf] }
  0x20   : > { %v1099_v31 = vperm.slane %v273_v30, 2  ;;  %v1101_v32 = vperm.slane %v273_v30, 1  ;;  %v1103_v33 = vperm.slane %v273_v30, 0  ;;  %v1115_v45 = vperm.slane %v273_v30, 3 }
  0x25   : > { %605 = vperm.xlu1 %976, %v949_v10   ;;  %546 = vperm.xlu0 %975, %v948_v11  }
  0x27   : > { %610 = vperm.xlu2 %977, %v950_v12  }
  0x2d   : > { %674 = vperm.xlu1 %976, %v952_v13   ;;  %669 = vperm.xlu0 %975, %v951_v14  }
  0x2f   : > { %733 = vperm.xlu2 %977, %v953_v15  }
  0x35   : > { %738 = vperm.xlu0 %975, %v954_v16   ;;  %243 = vperm.xlu1 %976, %v238_v17  }
  0x37   : > { %248 = vperm.xlu2 %977, %v239_v18  }
  0x69   : > { %v414_v28 = vpop.permute.xlu2 %413 }
  0x6a   : > { %v421_v58 = vmul.f32 %v414_v28, %v1103_v33  ;;  %v422_v59 = vmul.f32 %v414_v28, %v1101_v32  ;;  %v423_v63 = vmul.f32 %v414_v28, %v1099_v31  ;;  %v424_v0 = vmul.f32 %v414_v28, %v1115_v45 }
  0x71   : > { %v419_v29 = vpop.permute.xlu2 %418 }
  0x72   : > { %v425_v61 = vmul.f32 %v419_v29, %v1103_v33  ;;  %v426_v62 = vmul.f32 %v419_v29, %v1101_v32  ;;  %v428_v1 = vmul.f32 %v419_v29, %v1115_v45  ;;  %v427_v2 = vmul.f32 %v419_v29, %v1099_v31 }
  0x79   : > { %v1108_v38 = vpop.permute.xlu2 %541 }
  0x7a   : > { %v549_v12 = vmul.f32 %v1108_v38, %v1103_v33  ;;  %v551_v17 = vmul.f32 %v1108_v38, %v1099_v31  ;;  %v550_v19 = vmul.f32 %v1108_v38, %v1101_v32  ;;  %v552_v22 = vmul.f32 %v1108_v38, %v1115_v45 }
  0x7f   : > { %v277_v34 = vpop.permute.xlu0 %276  ;;  %v350_v43 = vpop.permute.xlu1 %349 }
  0x80   : > { %v295_v35 = vmul.f32 %v1099_v31, %v277_v34  ;;  %v294_v36 = vmul.f32 %v1101_v32, %v277_v34  ;;  %v293_v37 = vmul.f32 %v1103_v33, %v277_v34  ;;  %v357_v46 = vmul.f32 %v350_v43, %v1103_v33 }
  0x81   : > { %v1113_v44 = vpop.permute.xlu2 %610  ;;  %v296_v48 = vmul.f32 %v1115_v45, %v277_v34  ;;  %v359_v51 = vmul.f32 %v350_v43, %v1099_v31  ;;  %v358_v54 = vmul.f32 %v350_v43, %v1101_v32  ;;  %v360_v56 = vmul.f32 %v350_v43, %v1115_v45 }
  0x82   : > { %313 = vrot.lane.b32.xlu2 %v295_v35, %s989_s12  ;;  %311 = vrot.lane.b32.xlu1 %v294_v36, %s989_s12  ;;  %v617_v36 = vmul.f32 %v1113_v44, %v1103_v33 }
  0x83   : > { %309 = vrot.lane.b32.xlu0 %v293_v37, %s989_s12  ;;  %v618_v37 = vmul.f32 %v1113_v44, %v1101_v32 }
  0x87   : > { %v282_v39 = vpop.permute.xlu0 %281  ;;  %v355_v49 = vpop.permute.xlu1 %354 }
  0x88   : > { %v299_v40 = vmul.f32 %v1099_v31, %v282_v39  ;;  %v298_v41 = vmul.f32 %v1101_v32, %v282_v39  ;;  %v297_v42 = vmul.f32 %v1103_v33, %v282_v39  ;;  %v300_v47 = vmul.f32 %v1115_v45, %v282_v39 }
  0x89   : > { %v1120_v50 = vpop.permute.xlu2 %733  ;;  %v361_v52 = vmul.f32 %v355_v49, %v1103_v33  ;;  %v363_v55 = vmul.f32 %v355_v49, %v1099_v31  ;;  %v362_v57 = vmul.f32 %v355_v49, %v1101_v32  ;;  %v364_v60 = vmul.f32 %v355_v49, %v1115_v45 }
  0x8a   : > { %321 = vrot.lane.b32.xlu2 %v299_v40, %s989_s12  ;;  %319 = vrot.lane.b32.xlu1 %v298_v41, %s989_s12  ;;  %v1126_v53 = vmul.f32 %v1120_v50, %v1115_v45 }
  0x8b   : > { %317 = vrot.lane.b32.xlu0 %v297_v42, %s989_s12 }
  0x8f   : > { %v478_v3 = vpop.permute.xlu0 %477  ;;  %v483_v7 = vpop.permute.xlu1 %482 }
  0x90   : > { %v486_v4 = vmul.f32 %v478_v3, %v1101_v32  ;;  %v487_v5 = vmul.f32 %v478_v3, %v1099_v31  ;;  %v485_v6 = vmul.f32 %v478_v3, %v1103_v33  ;;  %v490_v8 = vmul.f32 %v483_v7, %v1101_v32 }
  0x91   : > { %v491_v9 = vmul.f32 %v483_v7, %v1099_v31  ;;  %v489_v10 = vmul.f32 %v483_v7, %v1103_v33  ;;  %v492_v11 = vmul.f32 %v483_v7, %v1115_v45  ;;  %v488_v13 = vmul.f32 %v478_v3, %v1115_v45  ;;  %v1151_v14 = vpop.permute.xlu2 %248 }
  0x92   : > { %323 = vrot.lane.b32.xlu1 %v300_v47, %s989_s12  ;;  %373 = vrot.lane.b32.xlu2 %v357_v46, %s990_s13  ;;  %v620_v47 = vmul.f32 %v1113_v44, %v1115_v45 }
  0x93   : > { %315 = vrot.lane.b32.xlu0 %v296_v48, %s989_s12  ;;  %v619_v48 = vmul.f32 %v1113_v44, %v1099_v31  ;;  %v240_v44 = vld [vmem:[#allocation2] sm:$0x7] }
  0x97   : > { %v547_v15 = vpop.permute.xlu0 %546  ;;  %v606_v16 = vpop.permute.xlu1 %605 }
  0x98   : > { %v553_v18 = vmul.f32 %v547_v15, %v1103_v33  ;;  %v555_v21 = vmul.f32 %v547_v15, %v1099_v31  ;;  %v554_v23 = vmul.f32 %v547_v15, %v1101_v32  ;;  %v613_v27 = vmul.f32 %v606_v16, %v1103_v33 }
  0x99   : > { %v614_v28 = vmul.f32 %v606_v16, %v1101_v32  ;;  %v556_v29 = vmul.f32 %v547_v15, %v1115_v45  ;;  %v615_v38 = vmul.f32 %v606_v16, %v1099_v31  ;;  %v616_v46 = vmul.f32 %v606_v16, %v1115_v45 }
  0x9a   : > { %377 = vrot.lane.b32.xlu1 %v359_v51, %s990_s13  ;;  %381 = vrot.lane.b32.xlu2 %v361_v52, %s990_s13 }
  0x9b   : > { %375 = vrot.lane.b32.xlu0 %v358_v54, %s990_s13 }
  0x9f   : > { %v1162_v24 = vpop.permute.xlu1 %674  ;;  %v1164_v25 = vpop.permute.xlu0 %669 }
  0xa0   : > { %v682_v3 = vmul.f32 %v1162_v24, %v1101_v32 }
  0xa2   : > { %385 = vrot.lane.b32.xlu1 %v363_v55, %s990_s13  ;;  %379 = vrot.lane.b32.xlu2 %v360_v56, %s990_s13  ;;  %v678_v56 = vmul.f32 %v1164_v25, %v1101_v32 }
  0xa3   : > { %383 = vrot.lane.b32.xlu0 %v362_v57, %s990_s13  ;;  %v679_v57 = vmul.f32 %v1164_v25, %v1099_v31 }
  0xa7   : > { %v244_v30 = vpop.permute.xlu1 %243  ;;  %v1169_v35 = vpop.permute.xlu0 %738 }
  0xaa   : > { %437 = vrot.lane.b32.xlu1 %v421_v58, %s991_s14  ;;  %439 = vrot.lane.b32.xlu2 %v422_v59, %s991_s14  ;;  %v677_v58 = vmul.f32 %v1164_v25, %v1103_v33 }
  0xab   : > { %387 = vrot.lane.b32.xlu0 %v364_v60, %s990_s13 }
  0xb2   : > { %445 = vrot.lane.b32.xlu1 %v425_v61, %s991_s14  ;;  %447 = vrot.lane.b32.xlu2 %v426_v62, %s991_s14 }
  0xb3   : > { %441 = vrot.lane.b32.xlu0 %v423_v63, %s991_s14  ;;  %v254_v63 = vperm.slane %v240_v44, 2 }
  0xba   : > { %443 = vrot.lane.b32.xlu1 %v424_v0, %s991_s14  ;;  %451 = vrot.lane.b32.xlu2 %v428_v1, %s991_s14  ;;  %v252_v1 = vperm.slane %v240_v44, 0 }
  0xbb   : > { %449 = vrot.lane.b32.xlu0 %v427_v2, %s991_s14  ;;  %v253_v2 = vperm.slane %v240_v44, 1  ;;  %s219_s14 = scalar_lea.vmem %s1341_s5, %s938_s11 }
  0xbc   : > { %v258_v7 = vmul.f32 %v252_v1, %v244_v30 }
  0xc2   : > { %503 = vrot.lane.b32.xlu1 %v486_v4, %s992_s15  ;;  %505 = vrot.lane.b32.xlu2 %v487_v5, %s992_s15  ;;  %v683_v4 = vmul.f32 %v1162_v24, %v1099_v31  ;;  %v681_v5 = vmul.f32 %v1162_v24, %v1103_v33 }
  0xc3   : > { %501 = vrot.lane.b32.xlu0 %v485_v6, %s992_s15  ;;  %v260_v6 = vmul.f32 %v254_v63, %v244_v30 }
  0xca   : > { %511 = vrot.lane.b32.xlu1 %v490_v8, %s992_s15  ;;  %513 = vrot.lane.b32.xlu2 %v491_v9, %s992_s15  ;;  %v259_v8 = vmul.f32 %v253_v2, %v244_v30 }
  0xcb   : > { %509 = vrot.lane.b32.xlu0 %v489_v10, %s992_s15 }
  0xd2   : > { %515 = vrot.lane.b32.xlu1 %v492_v11, %s992_s15  ;;  %565 = vrot.lane.b32.xlu2 %v549_v12, %s993_s16 }
  0xd3   : > { %507 = vrot.lane.b32.xlu0 %v488_v13, %s992_s15 }
  0xda   : > { %569 = vrot.lane.b32.xlu1 %v551_v17, %s993_s16  ;;  %573 = vrot.lane.b32.xlu2 %v553_v18, %s993_s16 }
  0xdb   : > { %567 = vrot.lane.b32.xlu0 %v550_v19, %s993_s16 }
  0xdc   : > { %v314_v20 = vpop.permute.xlu2 %313 }
  0xe2   : > { %577 = vrot.lane.b32.xlu1 %v555_v21, %s993_s16  ;;  %571 = vrot.lane.b32.xlu2 %v552_v22, %s993_s16  ;;  %v684_v22 = vmul.f32 %v1162_v24, %v1115_v45 }
  0xe3   : > { %575 = vrot.lane.b32.xlu0 %v554_v23, %s993_s16  ;;  %v741_v23 = vmul.f32 %v1120_v50, %v1103_v33 }
  0xe4   : > { %v322_v26 = vpop.permute.xlu2 %321 }
  0xea   : > { %629 = vrot.lane.b32.xlu1 %v613_v27, %s994_s17  ;;  %631 = vrot.lane.b32.xlu2 %v614_v28, %s994_s17  ;;  %v261_v27 = vmul.f32 %v252_v1, %v1151_v14  ;;  %v262_v28 = vmul.f32 %v253_v2, %v1151_v14 }
  0xeb   : > { %579 = vrot.lane.b32.xlu0 %v556_v29, %s993_s16 }
  0xec   : > { %v374_v34 = vpop.permute.xlu2 %373 }
  0xf2   : > { %637 = vrot.lane.b32.xlu1 %v617_v36, %s994_s17  ;;  %639 = vrot.lane.b32.xlu2 %v618_v37, %s994_s17 }
  0xf3   : > { %633 = vrot.lane.b32.xlu0 %v615_v38, %s994_s17 }
  0xf4   : > { %v312_v39 = vpop.permute.xlu1 %311  ;;  %v1176_v40 = vpop.permute.xlu2 %381 }
  0xf5   : > { %v327_v41 = vsel %vm325_vm4, %v312_v39, %v314_v20  ;;  %v310_v42 = vpop.permute.xlu0 %309 }
  0xf6   : > { %v326_v43 = vsel %vm325_vm4, %v310_v42, %v312_v39  ;;  %v339_v12 = vadd.f32 %v327_v41, %v259_v8  ;;  %v743_v41 = vmul.f32 %v1120_v50, %v1099_v31  ;;  %v745_v42 = vmul.f32 %v1169_v35, %v1103_v33 }
  0xf7   : > { %v338_v13 = vadd.f32 %v326_v43, %v258_v7  ;;  %v742_v43 = vmul.f32 %v1120_v50, %v1101_v32 }
  0xfa   : > { %635 = vrot.lane.b32.xlu1 %v616_v46, %s994_s17  ;;  %643 = vrot.lane.b32.xlu2 %v620_v47, %s994_s17 }
  0xfb   : > { %641 = vrot.lane.b32.xlu0 %v619_v48, %s994_s17 }
  0xfc   : > { %v320_v49 = vpop.permute.xlu1 %319  ;;  %v380_v51 = vpop.permute.xlu2 %379 }
  0xfd   : > { %v330_v52 = vsel %vm325_vm4, %v320_v49, %v322_v26  ;;  %v318_v54 = vpop.permute.xlu0 %317 }
  0xfe   : > { %v329_v55 = vsel %vm325_vm4, %v318_v54, %v320_v49  ;;  %v342_v24 = vadd.f32 %v330_v52, %v262_v28  ;;  %v747_v54 = vmul.f32 %v1169_v35, %v1099_v31 }
 0x102   : > { %695 = vrot.lane.b32.xlu1 %v678_v56, %s995_s20  ;;  %697 = vrot.lane.b32.xlu2 %v679_v57, %s995_s20 }
 0x103   : > { %693 = vrot.lane.b32.xlu0 %v677_v58, %s995_s20 }
 0x104   : > { %v324_v59 = vpop.permute.xlu1 %323  ;;  %v1196_v60 = vpop.permute.xlu2 %439 }
 0x105   : > { %v331_v61 = vsel %vm325_vm4, %v322_v26, %v324_v59  ;;  %v316_v62 = vpop.permute.xlu0 %315  ;;  %v680_v26 = vmul.f32 %v1164_v25, %v1115_v45 }
 0x106   : > { %v328_v0 = vsel %vm325_vm4, %v314_v20, %v316_v62 }
 0x107   : > { %v340_v9 = vadd.f32 %v328_v0, %v260_v6 }
 0x10a   : > { %703 = vrot.lane.b32.xlu1 %v682_v3, %s995_s20  ;;  %705 = vrot.lane.b32.xlu2 %v683_v4, %s995_s20 }
 0x10b   : > { %701 = vrot.lane.b32.xlu0 %v681_v5, %s995_s20 }
 0x10c   : > { %v378_v10 = vpop.permute.xlu1 %377  ;;  %v1209_v11 = vpop.permute.xlu2 %447 }
 0x10d   : > { %v392_v15 = vsel %vm389_vm5, %v378_v10, %v380_v51  ;;  %v376_v16 = vpop.permute.xlu0 %375 }
 0x10e   : > { %v404_v17 = vadd.f32 %v392_v15, %v340_v9  ;;  %v390_v18 = vsel %vm389_vm5, %v374_v34, %v376_v16  ;;  %v391_v19 = vsel %vm389_vm5, %v376_v16, %v378_v10  ;;  %v341_v34 = vadd.f32 %v329_v55, %v261_v27 }
 0x10f   : > { %v402_v20 = vadd.f32 %v390_v18, %v338_v13  ;;  %v403_v21 = vadd.f32 %v391_v19, %v339_v12  ;;  %v746_v55 = vmul.f32 %v1169_v35, %v1101_v32  ;;  %v748_v32 = vmul.f32 %v1169_v35, %v1115_v45 }
 0x112   : > { %707 = vrot.lane.b32.xlu1 %v684_v22, %s995_s20  ;;  %757 = vrot.lane.b32.xlu2 %v741_v23, %s996_s21 }
 0x113   : > { %699 = vrot.lane.b32.xlu0 %v680_v26, %s995_s20 }
 0x114   : > { %v386_v29 = vpop.permute.xlu1 %385  ;;  %v452_v30 = vpop.permute.xlu2 %451 }
 0x115   : > { %v384_v36 = vpop.permute.xlu0 %383 }
 0x116   : > { %v393_v37 = vsel %vm389_vm5, %v1176_v40, %v384_v36  ;;  %v394_v25 = vsel %vm389_vm5, %v384_v36, %v386_v29  ;;  %v263_v40 = vmul.f32 %v254_v63, %v1151_v14 }
 0x117   : > { %v405_v38 = vadd.f32 %v393_v37, %v341_v34  ;;  %v406_v39 = vadd.f32 %v394_v25, %v342_v24 }
 0x118   : > { %v343_v48 = vadd.f32 %v331_v61, %v263_v40 }
 0x11a   : > { %761 = vrot.lane.b32.xlu1 %v743_v41, %s996_s21  ;;  %765 = vrot.lane.b32.xlu2 %v745_v42, %s996_s21 }
 0x11b   : > { %759 = vrot.lane.b32.xlu0 %v742_v43, %s996_s21 }
 0x11c   : > { %v438_v46 = vpop.permute.xlu1 %437  ;;  %v506_v47 = vpop.permute.xlu2 %505 }
 0x11d   : > { %v454_v49 = vsel %vm453_vm6, %v438_v46, %v1196_v60  ;;  %v388_v51 = vpop.permute.xlu0 %387 }
 0x11e   : > { %v466_v33 = vadd.f32 %v454_v49, %v402_v20  ;;  %v395_v52 = vsel %vm389_vm5, %v386_v29, %v388_v51 }
 0x11f   : > { %v407_v50 = vadd.f32 %v395_v52, %v343_v48 }
 0x122   : > { %769 = vrot.lane.b32.xlu1 %v747_v54, %s996_s21  ;;  %763 = vrot.lane.b32.xlu2 %v1126_v53, %s996_s21 }
 0x123   : > { %767 = vrot.lane.b32.xlu0 %v746_v55, %s996_s21 }
 0x124   : > { %v446_v14 = vpop.permute.xlu1 %445  ;;  %v514_v56 = vpop.permute.xlu2 %513 }
 0x125   : > { %v457_v57 = vsel %vm453_vm6, %v446_v14, %v1209_v11  ;;  %v442_v58 = vpop.permute.xlu0 %441 }
 0x126   : > { %v469_v44 = vadd.f32 %v457_v57, %v405_v38  ;;  %v455_v31 = vsel %vm453_vm6, %v1196_v60, %v442_v58 }
 0x127   : > { %v467_v59 = vadd.f32 %v455_v31, %v403_v21 }
 0x12b   : > { %771 = vrot.lane.b32.xlu0 %v748_v32, %s996_s21 }
 0x12c   : > { %v444_v61 = vpop.permute.xlu1 %443  ;;  %v566_v53 = vpop.permute.xlu2 %565 }
 0x12d   : > { %v456_v62 = vsel %vm453_vm6, %v442_v58, %v444_v61  ;;  %v450_v63 = vpop.permute.xlu0 %449 }
 0x12e   : > { %v468_v0 = vadd.f32 %v456_v62, %v404_v17  ;;  %v458_v1 = vsel %vm453_vm6, %v1209_v11, %v450_v63  ;;  %v459_v2 = vsel %vm453_vm6, %v450_v63, %v452_v30 }
 0x12f   : > { %v470_v3 = vadd.f32 %v458_v1, %v406_v39  ;;  %v471_v4 = vadd.f32 %v459_v2, %v407_v50 }
 0x134   : > { %v504_v60 = vpop.permute.xlu1 %503  ;;  %v574_v5 = vpop.permute.xlu2 %573 }
 0x135   : > { %v519_v45 = vsel %vm517_vm7, %v504_v60, %v506_v47  ;;  %v502_v35 = vpop.permute.xlu0 %501 }
 0x136   : > { %v531_v6 = vadd.f32 %v519_v45, %v467_v59  ;;  %v518_v7 = vsel %vm517_vm7, %v502_v35, %v504_v60  ;;  %v798_v35 = vld [vmem:[%s1337_s1] sm:$0x7] }
 0x137   : > { %v530_v8 = vadd.f32 %v518_v7, %v466_v33 }
 0x13c   : > { %v512_v9 = vpop.permute.xlu1 %511  ;;  %v572_v10 = vpop.permute.xlu2 %571 }
 0x13d   : > { %v522_v12 = vsel %vm517_vm7, %v512_v9, %v514_v56  ;;  %v510_v13 = vpop.permute.xlu0 %509 }
 0x13e   : > { %v534_v11 = vadd.f32 %v522_v12, %v470_v3  ;;  %v521_v15 = vsel %vm517_vm7, %v510_v13, %v512_v9 }
 0x13f   : > { %v533_v16 = vadd.f32 %v521_v15, %v469_v44  ;;  %v801_v15 = vperm.slane %v798_v35, 1 }
 0x144   : > { %v516_v17 = vpop.permute.xlu1 %515  ;;  %v632_v21 = vpop.permute.xlu2 %631 }
 0x145   : > { %v523_v18 = vsel %vm517_vm7, %v514_v56, %v516_v17  ;;  %v508_v19 = vpop.permute.xlu0 %507 }
 0x146   : > { %v535_v20 = vadd.f32 %v523_v18, %v471_v4  ;;  %v520_v22 = vsel %vm517_vm7, %v506_v47, %v508_v19 }
 0x147   : > { %v532_v23 = vadd.f32 %v520_v22, %v468_v0 }
 0x14c   : > { %v570_v26 = vpop.permute.xlu1 %569  ;;  %v640_v30 = vpop.permute.xlu2 %639 }
 0x14d   : > { %v568_v27 = vpop.permute.xlu0 %567  ;;  %v584_v58 = vsel %vm581_vm8, %v570_v26, %v572_v10 }
 0x14e   : > { %v582_v28 = vsel %vm581_vm8, %v566_v53, %v568_v27  ;;  %v583_v31 = vsel %vm581_vm8, %v568_v27, %v570_v26  ;;  %v596_v32 = vadd.f32 %v584_v58, %v532_v23  ;;  %v802_v23 = vperm.slane %v798_v35, 2 }
 0x14f   : > { %v594_v29 = vadd.f32 %v582_v28, %v530_v8  ;;  %v595_v62 = vadd.f32 %v583_v31, %v531_v6 }
 0x154   : > { %v578_v24 = vpop.permute.xlu1 %577  ;;  %v1269_v39 = vpop.permute.xlu2 %643 }
 0x155   : > { %v576_v34 = vpop.permute.xlu0 %575 }
 0x156   : > { %v585_v36 = vsel %vm581_vm8, %v574_v5, %v576_v34  ;;  %v586_v37 = vsel %vm581_vm8, %v576_v34, %v578_v24 }
 0x157   : > { %v597_v25 = vadd.f32 %v585_v36, %v533_v16  ;;  %v598_v38 = vadd.f32 %v586_v37, %v534_v11  ;;  %v800_v11 = vperm.slane %v798_v35, 0 }
 0x15c   : > { %v630_v41 = vpop.permute.xlu1 %629  ;;  %v698_v46 = vpop.permute.xlu2 %697 }
 0x15d   : > { %v580_v42 = vpop.permute.xlu0 %579  ;;  %v646_v61 = vsel %vm645_vm9, %v630_v41, %v632_v21 }
 0x15e   : > { %v587_v43 = vsel %vm581_vm8, %v578_v24, %v580_v42  ;;  %v658_v3 = vadd.f32 %v646_v61, %v594_v29 }
 0x15f   : > { %v1272_v40 = vadd.f32 %v587_v43, %v535_v20 }
 0x164   : > { %v638_v47 = vpop.permute.xlu1 %637  ;;  %v1276_v33 = vpop.permute.xlu2 %705 }
 0x165   : > { %v634_v48 = vpop.permute.xlu0 %633  ;;  %v649_v18 = vsel %vm645_vm9, %v638_v47, %v640_v30 }
 0x166   : > { %v647_v53 = vsel %vm645_vm9, %v632_v21, %v634_v48  ;;  %v661_v28 = vadd.f32 %v649_v18, %v597_v25 }
 0x167   : > { %v659_v4 = vadd.f32 %v647_v53, %v595_v62 }
 0x16c   : > { %v636_v49 = vpop.permute.xlu1 %635  ;;  %v758_v54 = vpop.permute.xlu2 %757 }
 0x16d   : > { %v1274_v51 = vpop.permute.xlu0 %641  ;;  %v648_v59 = vsel %vm645_vm9, %v634_v48, %v636_v49 }
 0x16e   : > { %v660_v0 = vadd.f32 %v648_v59, %v596_v32  ;;  %v650_v19 = vsel %vm645_vm9, %v640_v30, %v1274_v51  ;;  %v651_v25 = vsel %vm645_vm9, %v1274_v51, %v1269_v39  ;;  %v820_v39 = vld [vmem:[%s1339_s3] sm:$0xff] }
 0x16f   : > { %v662_v29 = vadd.f32 %v650_v19, %v598_v38 }
 0x174   : > { %v696_v52 = vpop.permute.xlu1 %695  ;;  %v766_v56 = vpop.permute.xlu2 %765 }
 0x175   : > { %v694_v50 = vpop.permute.xlu0 %693  ;;  %v711_v1 = vsel %vm709_vm10, %v696_v52, %v698_v46 }
 0x176   : > { %v710_v2 = vsel %vm709_vm10, %v694_v50, %v696_v52  ;;  %v723_v7 = vadd.f32 %v711_v1, %v659_v4 }
 0x177   : > { %v722_v8 = vadd.f32 %v710_v2, %v658_v3 }
 0x17c   : > { %v704_v55 = vpop.permute.xlu1 %703  ;;  %v764_v60 = vpop.permute.xlu2 %763 }
 0x17d   : > { %v702_v14 = vpop.permute.xlu0 %701  ;;  %v714_v26 = vsel %vm709_vm10, %v704_v55, %v1276_v33 }
 0x17e   : > { %v713_v27 = vsel %vm709_vm10, %v702_v14, %v704_v55  ;;  %v726_v37 = vadd.f32 %v714_v26, %v662_v29  ;;  %v663_v55 = vadd.f32 %v651_v25, %v1272_v40  ;;  %v821_v40 = vld [vmem:[%s1339_s3 + $0x8] sm:$0xff] }
 0x17f   : > { %v725_v41 = vadd.f32 %v713_v27, %v661_v28 }
 0x184   : > { %v708_v57 = vpop.permute.xlu1 %707 }
 0x185   : > { %v700_v44 = vpop.permute.xlu0 %699 }
 0x186   : > { %v712_v63 = vsel %vm709_vm10, %v698_v46, %v700_v44 }
 0x187   : > { %v724_v5 = vadd.f32 %v712_v63, %v660_v0 }
 0x18c   : > { %v762_v45 = vpop.permute.xlu1 %761 }
 0x18d   : > { %v776_v6 = vsel %vm773_vm11, %v762_v45, %v764_v60  ;;  %v760_v9 = vpop.permute.xlu0 %759 }
 0x18e   : > { %v788_v10 = vadd.f32 %v776_v6, %v724_v5  ;;  %v774_v12 = vsel %vm773_vm11, %v758_v54, %v760_v9  ;;  %v775_v13 = vsel %vm773_vm11, %v760_v9, %v762_v45  ;;  %v715_v54 = vsel %vm709_vm10, %v1276_v33, %v708_v57  ;;  %v853_v6 = vld [vmem:[%s1340_s4 + $0x18] sm:$0xff]  ;;  %v852_v9 = vld [vmem:[%s1340_s4 + $0x10] sm:$0xff] }
 0x18f   : > { %v786_v16 = vadd.f32 %v774_v12, %v722_v8  ;;  %v787_v17 = vadd.f32 %v775_v13, %v723_v7  ;;  %869 = vmatpush.msra.mxu0 %v853_v6  ;;  %v850_v12 = vld [vmem:[%s1340_s4] sm:$0xff] }
 0x190   : > { %v794_v20 = vmax.f32 %v788_v10, 0.0  ;;  %v851_v10 = vld [vmem:[%s1340_s4 + $0x8] sm:$0xff] }
 0x191   : > { %v792_v21 = vmax.f32 %v786_v16, 0.0  ;;  %v793_v22 = vmax.f32 %v787_v17, 0.0  ;;  %870 = vmatpush.msra.mxu0 %v852_v9 }
 0x192   : > { %v808_v43 = vmul.f32 %v802_v23, %v794_v20 }
 0x193   : > { %v806_v24 = vmul.f32 %v800_v11, %v792_v21  ;;  %v807_v34 = vmul.f32 %v801_v15, %v793_v22  ;;  %871 = vmatpush.msra.mxu0 %v851_v10 }
 0x194   : > { %v770_v36 = vpop.permute.xlu1 %769 }
 0x195   : > { %v768_v42 = vpop.permute.xlu0 %767  ;;  %v812_v46 = vadd.f32 %v807_v34, %v806_v24  ;;  %872 = vmatpush.msra.mxu0 %v850_v12 }
 0x196   : > { %v777_v30 = vsel %vm773_vm11, %v766_v56, %v768_v42  ;;  %v778_v47 = vsel %vm773_vm11, %v768_v42, %v770_v36  ;;  %v727_v56 = vadd.f32 %v715_v54, %v663_v55 }
 0x197   : > { %v789_v48 = vadd.f32 %v777_v30, %v725_v41  ;;  %v790_v49 = vadd.f32 %v778_v47, %v726_v37  ;;  %v813_v52 = vadd.f32 %v812_v46, %v808_v43 }
 0x199   : > { %v795_v38 = vmax.f32 %v789_v48, 0.0  ;;  %v796_v50 = vmax.f32 %v790_v49, 0.0  ;;  %814 = vadd.xlane.f32.xlu1 %v813_v52 }
 0x19b   : > { %v809_v14 = vmul.f32 %v800_v11, %v795_v38  ;;  %v810_v58 = vmul.f32 %v801_v15, %v796_v50 }
 0x19d   : > { %v772_v44 = vpop.permute.xlu0 %771  ;;  %v816_v31 = vadd.f32 %v810_v58, %v809_v14 }
 0x19e   : > { %v779_v59 = vsel %vm773_vm11, %v770_v36, %v772_v44 }
 0x19f   : > { %v791_v32 = vadd.f32 %v779_v59, %v727_v56 }
 0x1a1   : > { %v797_v61 = vmax.f32 %v791_v32, 0.0 }
 0x1a3   : > { %v811_v53 = vmul.f32 %v802_v23, %v797_v61 }
 0x1a5   : > { %v817_v62 = vadd.f32 %v816_v31, %v811_v53 }
 0x1a7   : > { %818 = vadd.xlane.f32.xlu2 %v817_v62 }
 0x20c   : > { %v815_v51 = vpop.xlane.xlu1 %814 }
 0x20d   : > { %v822_v33 = vmul.f32 %v820_v39, %v815_v51 }
 0x20f   : > { %v825_v0 = vsel %vm824_vm12, %v822_v33, 0.0 }
 0x21a   : > { %v819_v57 = vpop.xlane.xlu2 %818 }
 0x21b   : > { %v823_v63 = vmul.f32 %v821_v40, %v819_v57 }
 0x21d   : > { %v826_v1 = vsel %vm824_vm12, %v823_v63, 0.0 }
 0x21e   : > { %v827_v2 = vadd.f32 %v826_v1, %v825_v0 }
 0x220   : > { %v828_v3 = vrot.slane %v827_v2, 4 }
 0x222   : > { %v829_v4 = vadd.f32 %v828_v3, %v827_v2 }
 0x224   : > { %v830_v60 = vrot.slane %v829_v4, 2 }
 0x226   : > { %v831_v5 = vadd.f32 %v830_v60, %v829_v4 }
 0x228   : > { %v832_v45 = vrot.slane %v831_v5, 1 }
 0x22a   : > { %v833_v35 = vadd.f32 %v832_v45, %v831_v5 }
 0x22c   : > { %v834_v7 = vmul.f32 %v833_v35, %v833_v35 }
 0x22e   : > { %v835_v8 = vsel %vm824_vm12, %v834_v7, 0.0 }
 0x22f   : > { %836 = vadd.xlane.f32.xlu0 %v835_v8 }
 0x2a2   : > { %v837_v13 = vpop.xlane.xlu0 %836 }
 0x2a3   : > { %v838_v11 = vmax.f32 %v837_v13, 1e-24 }
 0x2a5   : > { %978 = vrsqrt.f32 %v838_v11  ;;  %vm845_vm14 = vweird.f32 %v838_v11 }
 0x2ab   : > { %v979_v15 = vpop.eup %978 }
 0x2ac   : > { %v840_v16 = vmul.f32 %v979_v15, %v838_v11  ;;  %vm846_vm13 = vweird.f32 %v979_v15 }
 0x2ad   : > { %vm847_vm15 = vmor %vm845_vm14, %vm846_vm13 }
 0x2ae   : > { %v841_v17 = vmul.f32 %v979_v15, %v840_v16 }
 0x2b0   : > { %v842_v18 = vmul.f32 0.5, %v841_v17 }
 0x2b2   : > { %v843_v19 = vsub.f32 1.5, %v842_v18 }
 0x2b4   : > { %v844_v20 = vmul.f32 %v979_v15, %v843_v19 }
 0x2b6   : > { %v848_v21 = vsel %vm847_vm15, %v979_v15, %v844_v20 }
 0x2b7   : > { %v849_v22 = vmul.f32 %v848_v21, %v833_v35 }
 0x2b9   : > { %955 = vmatmul.msk.f32.vlgmr.msra.gmra.mxu0 %vm824_vm12, %v849_v22 }
 0x336   : > { %v874_v23 = vpop.f32.mrf.mxu0 }
 0x337   : > { %v877_v26 = vperm.slane %v874_v23, 0 }
 0x339   : > { %878 = vst [vmem:[%s219_s14] sm:$0xff] %v877_v26 }
 0x33a PF: > { %s15_s18 = sadd.s32 1, %s986_s18  }
 0x33b   : > { %p12_p4 = scmp.ge.s32.totalorder %s15_s18, 4  }
 0x33d   :  { %14 = sbr.rel (!%p12_p4) target bundleno = 1 (0x1), region = 78 }

</bundles_post_ra>
